<compile_context>
chip_gen: v7x
topology: tpu7x:2x2x1
jax: 0.10.0
libtpu: 0.0.40
codegen_flags: <defaults>
</compile_context>

<pallas_src>
import jax
import jax.numpy as jnp
from jax.experimental import pallas as pl
from jax.experimental.pallas import tpu as pltpu

N_INPUT, N_HIDDEN, N_OUTPUT = 12, 24, 18
_ALIGN = 256  # lane/MXU-pass alignment for the batch (lane) dimension


def mlp_kernel(x_ref,
               w1_ref, b1_ref,
               w2_ref, b2_ref,
               w3_ref, b3_ref,
               w4_ref, b4_ref,
               w5_ref, b5_ref,
               w6_ref, b6_ref,
               o_ref):
    # Feature-major: x_ref is (12, TILE_B); each layer produces (out, TILE_B).
    h = x_ref[...]

    def linear(h, w_ref, b_ref):
        # (out, in) @ (in, TILE_B) -> (out, TILE_B); bias (out, 1) broadcasts over lanes.
        return jnp.dot(w_ref[...], h, preferred_element_type=jnp.float32) + b_ref[...]

    h = jnp.maximum(linear(h, w1_ref, b1_ref), 0.0)
    h = jnp.maximum(linear(h, w2_ref, b2_ref), 0.0)
    h = jnp.maximum(linear(h, w3_ref, b3_ref), 0.0)
    h = jnp.maximum(linear(h, w4_ref, b4_ref), 0.0)
    h = jnp.maximum(linear(h, w5_ref, b5_ref), 0.0)
    h = linear(h, w6_ref, b6_ref)            # final layer: no ReLU
    o_ref[...] = h.astype(o_ref.dtype)


def _round_up(n, m):
    return ((n + m - 1) // m) * m


def _choose_tile(B, requested):
    """Pick a lane-aligned batch tile.

    - B <= _ALIGN: single full-array tile (no padding, block == full dims is legal).
    - Otherwise: multiple of 256, capped so there are >= 2 tiles (keeps both v7x TCs
      busy), and preferring a divisor of B so no pad/slice pass is needed.
    """
    if B <= _ALIGN:
        return B, B  # tile_b, B_pad
    requested = max(_ALIGN, _round_up(requested, _ALIGN))
    tile_b = min(requested, _round_up(max(B // 2, _ALIGN), _ALIGN))
    if B % _ALIGN == 0:
        t = tile_b
        while t > _ALIGN and B % t != 0:
            t -= _ALIGN
        if B % t == 0:
            tile_b = t
    B_pad = _round_up(B, tile_b)
    return tile_b, B_pad


def mynn_forward(x, params, tile_b=4096):
    """x: (B, N_INPUT) float32; params: list of (W (out,in), b (out,1)) pairs."""
    B = x.shape[0]
    tile_b, B_pad = _choose_tile(B, tile_b)
    n_tiles = B_pad // tile_b

    # Feature-major activations: lanes carry the batch.
    xt = x.T                                  # (N_INPUT, B)
    if B_pad != B:
        xt = jnp.pad(xt, ((0, 0), (0, B_pad - B)))

    flat = []
    for w, b in params:
        flat += [w, b]

    in_specs = [pl.BlockSpec((N_INPUT, tile_b), lambda i: (0, i))]
    # Weights/biases: full-array blocks, constant index -> loaded once, VMEM-resident.
    in_specs += [pl.BlockSpec(a.shape, lambda i: (0, 0)) for a in flat]
    out_spec = pl.BlockSpec((N_OUTPUT, tile_b), lambda i: (0, i))

    out_t = pl.pallas_call(
        mlp_kernel,
        out_shape=jax.ShapeDtypeStruct((N_OUTPUT, B_pad), jnp.float32),
        grid=(n_tiles,),
        in_specs=in_specs,
        out_specs=out_spec,
        compiler_params=pltpu.CompilerParams(
            dimension_semantics=("parallel",),   # batch tiles shard across v7x's 2 TCs
        ),
    )(xt, *flat)

    out_t = out_t if B_pad == B else out_t[:, :B]
    return out_t.T                              # (B, N_OUTPUT)


def init_params(key):
    """Deterministic init mimicking nn.Linear default (uniform +/- 1/sqrt(fan_in)).

    W stored (out_features, in_features) -- PyTorch's native layout; b stored (out, 1).
    """
    dims = [(N_INPUT, N_HIDDEN),
            (N_HIDDEN, N_HIDDEN),
            (N_HIDDEN, N_HIDDEN),
            (N_HIDDEN, N_HIDDEN),
            (N_HIDDEN, N_HIDDEN),
            (N_HIDDEN, N_OUTPUT)]
    params = []
    for (fan_in, fan_out) in dims:
        key, kw, kb = jax.random.split(key, 3)
        bound = 1.0 / (fan_in ** 0.5)
        w = jax.random.uniform(kw, (fan_out, fan_in), jnp.float32, -bound, bound)
        b = jax.random.uniform(kb, (fan_out, 1), jnp.float32, -bound, bound)
        params.append((w, b))
    return params


def reference_forward(x, params):
    """Pure-JAX reference matching PyTorch nn.Linear semantics (y = x @ W.T + b)."""
    h = x
    for i, (w, b) in enumerate(params):
        h = h @ w.T + b.T
        if i < len(params) - 1:
            h = jnp.maximum(h, 0.0)
    return h


# TODO(synk): my_trig_layer is defined on the PyTorch module but unused in forward(); not implemented.

if __name__ == "__main__":
    key = jax.random.PRNGKey(0)
    kx, kx2, kp = jax.random.split(key, 3)
    params = init_params(kp)

    # Small-batch check (single full-array tile, no padding).
    B = 8
    x = jax.random.normal(kx, (B, N_INPUT), jnp.float32)
    out = jax.block_until_ready(mynn_forward(x, params))
    ref = reference_forward(x, params)
    assert out.shape == (B, N_OUTPUT)
    assert jnp.allclose(out, ref, atol=1e-4, rtol=1e-4), "mismatch vs JAX reference (B=8)"

    # Multi-tile check with a ragged batch (exercises tile choice, padding, slice-back).
    B2 = 600
    x2 = jax.random.normal(kx2, (B2, N_INPUT), jnp.float32)
    out2 = jax.block_until_ready(mynn_forward(x2, params))
    ref2 = reference_forward(x2, params)
    assert out2.shape == (B2, N_OUTPUT)
    assert jnp.allclose(out2, ref2, atol=1e-4, rtol=1e-4), "mismatch vs JAX reference (B=600)"

    print("KERNEL_OK")
</pallas_src>

<mosaic_0001>
module attributes {stable_mosaic.version = 11 : i64} {
  func.func @mlp_kernel(%arg0: i32, %arg1: memref<12x8xf32, #tpu.memory_space<vmem>>, %arg2: memref<24x12xf32, #tpu.memory_space<vmem>>, %arg3: memref<24x1xf32, #tpu.memory_space<vmem>>, %arg4: memref<24x24xf32, #tpu.memory_space<vmem>>, %arg5: memref<24x1xf32, #tpu.memory_space<vmem>>, %arg6: memref<24x24xf32, #tpu.memory_space<vmem>>, %arg7: memref<24x1xf32, #tpu.memory_space<vmem>>, %arg8: memref<24x24xf32, #tpu.memory_space<vmem>>, %arg9: memref<24x1xf32, #tpu.memory_space<vmem>>, %arg10: memref<24x24xf32, #tpu.memory_space<vmem>>, %arg11: memref<24x1xf32, #tpu.memory_space<vmem>>, %arg12: memref<18x24xf32, #tpu.memory_space<vmem>>, %arg13: memref<18x1xf32, #tpu.memory_space<vmem>>, %arg14: memref<18x8xf32, #tpu.memory_space<vmem>>) attributes {dimension_semantics = [#tpu.dimension_semantics<parallel>], iteration_bounds = array<i64: 1>, scalar_prefetch = 0 : i64, scratch_operands = 0 : i64, tpu.core_type = #tpu.core_type<tc>, window_params = [{transform_indices = @transform_0, window_bounds = array<i64: 12, 8>}, {pipeline_mode = #tpu.pipeline_mode<synchronous>, transform_indices = @transform_1, window_bounds = array<i64: 24, 12>}, {pipeline_mode = #tpu.pipeline_mode<synchronous>, transform_indices = @transform_2, window_bounds = array<i64: 24, 1>}, {pipeline_mode = #tpu.pipeline_mode<synchronous>, transform_indices = @transform_3, window_bounds = array<i64: 24, 24>}, {pipeline_mode = #tpu.pipeline_mode<synchronous>, transform_indices = @transform_4, window_bounds = array<i64: 24, 1>}, {pipeline_mode = #tpu.pipeline_mode<synchronous>, transform_indices = @transform_5, window_bounds = array<i64: 24, 24>}, {pipeline_mode = #tpu.pipeline_mode<synchronous>, transform_indices = @transform_6, window_bounds = array<i64: 24, 1>}, {pipeline_mode = #tpu.pipeline_mode<synchronous>, transform_indices = @transform_7, window_bounds = array<i64: 24, 24>}, {pipeline_mode = #tpu.pipeline_mode<synchronous>, transform_indices = @transform_8, window_bounds = array<i64: 24, 1>}, {pipeline_mode = #tpu.pipeline_mode<synchronous>, transform_indices = @transform_9, window_bounds = array<i64: 24, 24>}, {pipeline_mode = #tpu.pipeline_mode<synchronous>, transform_indices = @transform_10, window_bounds = array<i64: 24, 1>}, {pipeline_mode = #tpu.pipeline_mode<synchronous>, transform_indices = @transform_11, window_bounds = array<i64: 18, 24>}, {pipeline_mode = #tpu.pipeline_mode<synchronous>, transform_indices = @transform_12, window_bounds = array<i64: 18, 1>}, {transform_indices = @transform_13, window_bounds = array<i64: 18, 8>}]} {
    %c0 = arith.constant 0 : index
    %c0_0 = arith.constant 0 : index
    %0 = vector.load %arg1[%c0, %c0_0] : memref<12x8xf32, #tpu.memory_space<vmem>>, vector<12x8xf32>
    %c0_1 = arith.constant 0 : index
    %c0_2 = arith.constant 0 : index
    %1 = vector.load %arg2[%c0_1, %c0_2] : memref<24x12xf32, #tpu.memory_space<vmem>>, vector<24x12xf32>
    %cst = arith.constant dense<0.000000e+00> : vector<24x8xf32>
    %2 = tpu.matmul %1, %0, %cst {dimension_numbers = #tpu.dot_dimension_numbers<[1], [0], [0], [1], [0, 0, 1, 1], [], []>} : vector<24x12xf32>, vector<12x8xf32>, vector<24x8xf32> -> vector<24x8xf32>
    %c0_3 = arith.constant 0 : index
    %c0_4 = arith.constant 0 : index
    %3 = vector.load %arg3[%c0_3, %c0_4] : memref<24x1xf32, #tpu.memory_space<vmem>>, vector<24x1xf32>
    %4 = vector.broadcast %3 : vector<24x1xf32> to vector<24x8xf32>
    %5 = arith.addf %2, %4 : vector<24x8xf32>
    %cst_5 = arith.constant 0.000000e+00 : f32
    %6 = vector.broadcast %cst_5 : f32 to vector<24x8xf32>
    %7 = arith.maximumf %5, %6 : vector<24x8xf32>
    %c0_6 = arith.constant 0 : index
    %c0_7 = arith.constant 0 : index
    %8 = vector.load %arg4[%c0_6, %c0_7] : memref<24x24xf32, #tpu.memory_space<vmem>>, vector<24x24xf32>
    %cst_8 = arith.constant dense<0.000000e+00> : vector<24x8xf32>
    %9 = tpu.matmul %8, %7, %cst_8 {dimension_numbers = #tpu.dot_dimension_numbers<[1], [0], [0], [1], [0, 0, 1, 1], [], []>} : vector<24x24xf32>, vector<24x8xf32>, vector<24x8xf32> -> vector<24x8xf32>
    %c0_9 = arith.constant 0 : index
    %c0_10 = arith.constant 0 : index
    %10 = vector.load %arg5[%c0_9, %c0_10] : memref<24x1xf32, #tpu.memory_space<vmem>>, vector<24x1xf32>
    %11 = vector.broadcast %10 : vector<24x1xf32> to vector<24x8xf32>
    %12 = arith.addf %9, %11 : vector<24x8xf32>
    %cst_11 = arith.constant 0.000000e+00 : f32
    %13 = vector.broadcast %cst_11 : f32 to vector<24x8xf32>
    %14 = arith.maximumf %12, %13 : vector<24x8xf32>
    %c0_12 = arith.constant 0 : index
    %c0_13 = arith.constant 0 : index
    %15 = vector.load %arg6[%c0_12, %c0_13] : memref<24x24xf32, #tpu.memory_space<vmem>>, vector<24x24xf32>
    %cst_14 = arith.constant dense<0.000000e+00> : vector<24x8xf32>
    %16 = tpu.matmul %15, %14, %cst_14 {dimension_numbers = #tpu.dot_dimension_numbers<[1], [0], [0], [1], [0, 0, 1, 1], [], []>} : vector<24x24xf32>, vector<24x8xf32>, vector<24x8xf32> -> vector<24x8xf32>
    %c0_15 = arith.constant 0 : index
    %c0_16 = arith.constant 0 : index
    %17 = vector.load %arg7[%c0_15, %c0_16] : memref<24x1xf32, #tpu.memory_space<vmem>>, vector<24x1xf32>
    %18 = vector.broadcast %17 : vector<24x1xf32> to vector<24x8xf32>
    %19 = arith.addf %16, %18 : vector<24x8xf32>
    %cst_17 = arith.constant 0.000000e+00 : f32
    %20 = vector.broadcast %cst_17 : f32 to vector<24x8xf32>
    %21 = arith.maximumf %19, %20 : vector<24x8xf32>
    %c0_18 = arith.constant 0 : index
    %c0_19 = arith.constant 0 : index
    %22 = vector.load %arg8[%c0_18, %c0_19] : memref<24x24xf32, #tpu.memory_space<vmem>>, vector<24x24xf32>
    %cst_20 = arith.constant dense<0.000000e+00> : vector<24x8xf32>
    %23 = tpu.matmul %22, %21, %cst_20 {dimension_numbers = #tpu.dot_dimension_numbers<[1], [0], [0], [1], [0, 0, 1, 1], [], []>} : vector<24x24xf32>, vector<24x8xf32>, vector<24x8xf32> -> vector<24x8xf32>
    %c0_21 = arith.constant 0 : index
    %c0_22 = arith.constant 0 : index
    %24 = vector.load %arg9[%c0_21, %c0_22] : memref<24x1xf32, #tpu.memory_space<vmem>>, vector<24x1xf32>
    %25 = vector.broadcast %24 : vector<24x1xf32> to vector<24x8xf32>
    %26 = arith.addf %23, %25 : vector<24x8xf32>
    %cst_23 = arith.constant 0.000000e+00 : f32
    %27 = vector.broadcast %cst_23 : f32 to vector<24x8xf32>
    %28 = arith.maximumf %26, %27 : vector<24x8xf32>
    %c0_24 = arith.constant 0 : index
    %c0_25 = arith.constant 0 : index
    %29 = vector.load %arg10[%c0_24, %c0_25] : memref<24x24xf32, #tpu.memory_space<vmem>>, vector<24x24xf32>
    %cst_26 = arith.constant dense<0.000000e+00> : vector<24x8xf32>
    %30 = tpu.matmul %29, %28, %cst_26 {dimension_numbers = #tpu.dot_dimension_numbers<[1], [0], [0], [1], [0, 0, 1, 1], [], []>} : vector<24x24xf32>, vector<24x8xf32>, vector<24x8xf32> -> vector<24x8xf32>
    %c0_27 = arith.constant 0 : index
    %c0_28 = arith.constant 0 : index
    %31 = vector.load %arg11[%c0_27, %c0_28] : memref<24x1xf32, #tpu.memory_space<vmem>>, vector<24x1xf32>
    %32 = vector.broadcast %31 : vector<24x1xf32> to vector<24x8xf32>
    %33 = arith.addf %30, %32 : vector<24x8xf32>
    %cst_29 = arith.constant 0.000000e+00 : f32
    %34 = vector.broadcast %cst_29 : f32 to vector<24x8xf32>
    %35 = arith.maximumf %33, %34 : vector<24x8xf32>
    %c0_30 = arith.constant 0 : index
    %c0_31 = arith.constant 0 : index
    %36 = vector.load %arg12[%c0_30, %c0_31] : memref<18x24xf32, #tpu.memory_space<vmem>>, vector<18x24xf32>
    %cst_32 = arith.constant dense<0.000000e+00> : vector<18x8xf32>
    %37 = tpu.matmul %36, %35, %cst_32 {dimension_numbers = #tpu.dot_dimension_numbers<[1], [0], [0], [1], [0, 0, 1, 1], [], []>} : vector<18x24xf32>, vector<24x8xf32>, vector<18x8xf32> -> vector<18x8xf32>
    %c0_33 = arith.constant 0 : index
    %c0_34 = arith.constant 0 : index
    %38 = vector.load %arg13[%c0_33, %c0_34] : memref<18x1xf32, #tpu.memory_space<vmem>>, vector<18x1xf32>
    %39 = vector.broadcast %38 : vector<18x1xf32> to vector<18x8xf32>
    %40 = arith.addf %37, %39 : vector<18x8xf32>
    %c0_35 = arith.constant 0 : index
    %c0_36 = arith.constant 0 : index
    %41 = vector.load %arg14[%c0_35, %c0_36] : memref<18x8xf32, #tpu.memory_space<vmem>>, vector<18x8xf32>
    tpu.vector_store %arg14[%c0_35, %c0_36], %40 {strides = array<i32>} : memref<18x8xf32, #tpu.memory_space<vmem>>, vector<18x8xf32>,
    return
  }
  func.func @transform_0(%arg0: i32) -> (i32, i32) {
    %c0_i32 = arith.constant 0 : i32
    %c0_i32_0 = arith.constant 0 : i32
    return %c0_i32, %arg0 : i32, i32
  }
  func.func @transform_1(%arg0: i32) -> (i32, i32) {
    %c0_i32 = arith.constant 0 : i32
    %c0_i32_0 = arith.constant 0 : i32
    %c0_i32_1 = arith.constant 0 : i32
    return %c0_i32, %c0_i32_0 : i32, i32
  }
  func.func @transform_2(%arg0: i32) -> (i32, i32) {
    %c0_i32 = arith.constant 0 : i32
    %c0_i32_0 = arith.constant 0 : i32
    %c0_i32_1 = arith.constant 0 : i32
    return %c0_i32, %c0_i32_0 : i32, i32
  }
  func.func @transform_3(%arg0: i32) -> (i32, i32) {
    %c0_i32 = arith.constant 0 : i32
    %c0_i32_0 = arith.constant 0 : i32
    %c0_i32_1 = arith.constant 0 : i32
    return %c0_i32, %c0_i32_0 : i32, i32
  }
  func.func @transform_4(%arg0: i32) -> (i32, i32) {
    %c0_i32 = arith.constant 0 : i32
    %c0_i32_0 = arith.constant 0 : i32
    %c0_i32_1 = arith.constant 0 : i32
    return %c0_i32, %c0_i32_0 : i32, i32
  }
  func.func @transform_5(%arg0: i32) -> (i32, i32) {
    %c0_i32 = arith.constant 0 : i32
    %c0_i32_0 = arith.constant 0 : i32
    %c0_i32_1 = arith.constant 0 : i32
    return %c0_i32, %c0_i32_0 : i32, i32
  }
  func.func @transform_6(%arg0: i32) -> (i32, i32) {
    %c0_i32 = arith.constant 0 : i32
    %c0_i32_0 = arith.constant 0 : i32
    %c0_i32_1 = arith.constant 0 : i32
    return %c0_i32, %c0_i32_0 : i32, i32
  }
  func.func @transform_7(%arg0: i32) -> (i32, i32) {
    %c0_i32 = arith.constant 0 : i32
    %c0_i32_0 = arith.constant 0 : i32
    %c0_i32_1 = arith.constant 0 : i32
    return %c0_i32, %c0_i32_0 : i32, i32
  }
  func.func @transform_8(%arg0: i32) -> (i32, i32) {
    %c0_i32 = arith.constant 0 : i32
    %c0_i32_0 = arith.constant 0 : i32
    %c0_i32_1 = arith.constant 0 : i32
    return %c0_i32, %c0_i32_0 : i32, i32
  }
  func.func @transform_9(%arg0: i32) -> (i32, i32) {
    %c0_i32 = arith.constant 0 : i32
    %c0_i32_0 = arith.constant 0 : i32
    %c0_i32_1 = arith.constant 0 : i32
    return %c0_i32, %c0_i32_0 : i32, i32
  }
  func.func @transform_10(%arg0: i32) -> (i32, i32) {
    %c0_i32 = arith.constant 0 : i32
    %c0_i32_0 = arith.constant 0 : i32
    %c0_i32_1 = arith.constant 0 : i32
    return %c0_i32, %c0_i32_0 : i32, i32
  }
  func.func @transform_11(%arg0: i32) -> (i32, i32) {
    %c0_i32 = arith.constant 0 : i32
    %c0_i32_0 = arith.constant 0 : i32
    %c0_i32_1 = arith.constant 0 : i32
    return %c0_i32, %c0_i32_0 : i32, i32
  }
  func.func @transform_12(%arg0: i32) -> (i32, i32) {
    %c0_i32 = arith.constant 0 : i32
    %c0_i32_0 = arith.constant 0 : i32
    %c0_i32_1 = arith.constant 0 : i32
    return %c0_i32, %c0_i32_0 : i32, i32
  }
  func.func @transform_13(%arg0: i32) -> (i32, i32) {
    %c0_i32 = arith.constant 0 : i32
    %c0_i32_0 = arith.constant 0 : i32
    return %c0_i32, %arg0 : i32, i32
  }
}

</mosaic_0001>

<bundles_post_ra>
// kernel: tpu_custom_call.1
= control target key start
LH: loop header
LB: loop body
LE: loop exit
PB: predicated region body
PF: predicated region fallthrough
CT: control target
= control target key end

     0   :  { %vm77_vm0 = vcmask 1043456   ;;  %v904_v0 = vmov 0.0|0.0   ;;  %vm905_vm1 = vmmov 1   ;;  %vm906_vm3 = vmmov 0   ;;  %s1167_s0 = inlined_call_operand.vmem [shape: f32[12,8], index: 0, kind: input, shape index: {}]   ;;  %s1168_s2 = inlined_call_operand.vmem [shape: f32[24,1], index: 2, kind: input, shape index: {}]   ;;  %s1169_s1 = inlined_call_operand.vmem [shape: f32[24,12], index: 1, kind: input, shape index: {}]   ;;  %s1170_s4 = inlined_call_operand.vmem [shape: f32[24,1], index: 4, kind: input, shape index: {}]   ;;  %s1171_s6 = inlined_call_operand.vmem [shape: f32[24,1], index: 6, kind: input, shape index: {}]   ;;  %s1172_s8 = inlined_call_operand.vmem [shape: f32[24,1], index: 8, kind: input, shape index: {}]   ;;  %s1173_s10 = inlined_call_operand.vmem [shape: f32[24,1], index: 10, kind: input, shape index: {}]   ;;  %s1174_s12 = inlined_call_operand.vmem [shape: f32[18,1], index: 12, kind: input, shape index: {}]   ;;  %s1175_s3 = inlined_call_operand.vmem [shape: f32[24,24], index: 3, kind: input, shape index: {}]   ;;  %s1176_s5 = inlined_call_operand.vmem [shape: f32[24,24], index: 5, kind: input, shape index: {}]   ;;  %s1177_s7 = inlined_call_operand.vmem [shape: f32[24,24], index: 7, kind: input, shape index: {}]   ;;  %s1178_s9 = inlined_call_operand.vmem [shape: f32[24,24], index: 9, kind: input, shape index: {}]   ;;  %s1179_s11 = inlined_call_operand.vmem [shape: f32[18,24], index: 11, kind: input, shape index: {}]   ;;  %s1180_s13 = inlined_call_operand.vmem [shape: f32[18,8], index: 13, kind: output, shape index: {}]  }
   0x1   :  { %878 = vmatprep.subr.bf16.mxu0 %v904_v0  ;;  %v44_v1 = vld [vmem:[%s1167_s0] sm:$0xff]  ;;  %v45_v2 = vld [vmem:[%s1167_s0 + $0x8] sm:$0xf]  ;;  %vm880_vm2 = vmpackc.low %vm77_vm0, %vm905_vm1  ;;  %882 = vmatprep.subr.bf16.mxu1 %v904_v0  ;;  %v907_v4 = vmov 0.0   ;;  %v908_v5 = vmov 0   ;;  %vm67_vm4 = vcmask 97280  }
   0x2   :  { %v879_v3 = vpack.c.bf16 %v45_v2, %v44_v1  ;;  %794 = vmatprep.mubr.msk.f32.mxu0 %vm906_vm3, %v907_v4  ;;  %902 = vset.pattern.permute.xlu0 %v908_v5  ;;  %v49_v6 = vld [vmem:[%s1168_s2] sm:$0xff]  ;;  %v51_v8 = vld [vmem:[%s1168_s2 + $0x10] sm:$0xff]  ;;  %v50_v9 = vld [vmem:[%s1168_s2 + $0x8] sm:$0xff]  ;;  %vm185_vm5 = vcmask 195584   ;;  %vm727_vm6 = vcmask 64512   ;;  %vm730_vm7 = vcmask 58368  }
   0x3   :  { %903 = vset.pattern.permute.xlu1 %v908_v5  ;;  %809 = vmatprep.mubr.msk.f32.mxu1 %vm906_vm3, %v907_v4  ;;  %v46_v7 = vld [vmem:[%s1169_s1] sm:$0xff]  ;;  %v47_v11 = vld [vmem:[%s1169_s1 + $0x8] sm:$0xff]  ;;  %v169_v13 = vld [vmem:[%s1170_s4 + $0x10] sm:$0xff] }
   0x4   :  { %881 = vmatpush3.bf16.msk.msra.mxu0 %vm880_vm2, %v879_v3  ;;  %54 = vperm.xlu0 %902, %v49_v6   ;;  %v167_v10 = vld [vmem:[%s1170_s4] sm:$0xff]  ;;  %v168_v12 = vld [vmem:[%s1170_s4 + $0x8] sm:$0xff]  ;;  %v48_v14 = vld [vmem:[%s1169_s1 + $0x10] sm:$0xff] }
   0x5   :  { %64 = vperm.xlu1 %903, %v51_v8   ;;  %885 = vmatprep.subr.bf16.mxu0 %v904_v0  ;;  %v281_v15 = vld [vmem:[%s1171_s6] sm:$0xff]  ;;  %v282_v16 = vld [vmem:[%s1171_s6 + $0x8] sm:$0xff]  ;;  %v283_v17 = vld [vmem:[%s1171_s6 + $0x10] sm:$0xff] }
   0x6   :  { %v394_v18 = vld [vmem:[%s1172_s8] sm:$0xff]  ;;  %v395_v19 = vld [vmem:[%s1172_s8 + $0x8] sm:$0xff]  ;;  %v396_v20 = vld [vmem:[%s1172_s8 + $0x10] sm:$0xff] }
   0x7   :  { %795 = vmatmul.mubr.msk.f32.vlgmr.msra.gmra.mrb[0].mxu0 %vm67_vm4, %v46_v7  ;;  %v507_v21 = vld [vmem:[%s1173_s10] sm:$0xff]  ;;  %v508_v22 = vld [vmem:[%s1173_s10 + $0x8] sm:$0xff]  ;;  %v509_v23 = vld [vmem:[%s1173_s10 + $0x10] sm:$0xff] }
   0x8   :  { %797 = vmatprep.mubr.msk.f32.mxu0 %vm906_vm3, %v907_v4  ;;  %59 = vperm.xlu0 %902, %v50_v9   ;;  %v620_v24 = vld [vmem:[%s1174_s12] sm:$0xff]  ;;  %v621_v25 = vld [vmem:[%s1174_s12 + $0x8] sm:$0xff]  ;;  %v622_v26 = vld [vmem:[%s1174_s12 + $0x10] sm:$0x3] }
   0x9   :  { %172 = vperm.xlu1 %903, %v167_v10   ;;  %v164_v43 = vld [vmem:[%s1175_s3] sm:$0xff]  ;;  %v165_v44 = vld [vmem:[%s1175_s3 + $0x8] sm:$0xff]  ;;  %v166_v45 = vld [vmem:[%s1175_s3 + $0x10] sm:$0xff] }
   0xa   :  { %v278_v62 = vld [vmem:[%s1176_s5] sm:$0xff]  ;;  %v279_v63 = vld [vmem:[%s1176_s5 + $0x8] sm:$0xff]  ;;  %v280_v1 = vld [vmem:[%s1176_s5 + $0x10] sm:$0xff] }
   0xb   :  { %798 = vmatmul.mubr.msk.f32.gmra.mrb[2].mxu0 %vm67_vm4, %v47_v11 }
   0xc   :  { %800 = vmatprep.mubr.msk.f32.mxu0 %vm906_vm3, %v907_v4  ;;  %177 = vperm.xlu0 %902, %v168_v12  }
   0xd   :  { %182 = vperm.xlu1 %903, %v169_v13  }
   0xf   :  { %801 = vmatmul.mubr.msk.f32.gmra.mrb[4].mxu0 %vm67_vm4, %v48_v14 }
  0x10   :  { %286 = vperm.xlu0 %902, %v281_v15   ;;  %824 = vmatprep.mubr.msk.f32.mxu0 %vm906_vm3, %v907_v4 }
  0x11   :  { %291 = vperm.xlu1 %903, %v282_v16  }
  0x14   :  { %296 = vperm.xlu0 %902, %v283_v17  }
  0x15   :  { %399 = vperm.xlu1 %903, %v394_v18  }
  0x18   :  { %404 = vperm.xlu0 %902, %v395_v19   ;;  %v391_v19 = vld [vmem:[%s1177_s7] sm:$0xff] }
  0x19   :  { %409 = vperm.xlu1 %903, %v396_v20   ;;  %v392_v20 = vld [vmem:[%s1177_s7 + $0x8] sm:$0xff] }
  0x1c   :  { %512 = vperm.xlu0 %902, %v507_v21   ;;  %v393_v21 = vld [vmem:[%s1177_s7 + $0x10] sm:$0xff] }
  0x1d   :  { %517 = vperm.xlu1 %903, %v508_v22  }
  0x20   :  { %522 = vperm.xlu0 %902, %v509_v23  }
  0x21   :  { %625 = vperm.xlu1 %903, %v620_v24  }
  0x24   :  { %630 = vperm.xlu0 %902, %v621_v25  }
  0x25   :  { %635 = vperm.xlu1 %903, %v622_v26  }
  0x83   :  { %v55_v27 = vpop.permute.xlu0 %54 }
  0x84   :  { %v65_v37 = vpop.permute.xlu1 %64 }
  0x87   :  { %v60_v31 = vpop.permute.xlu0 %59 }
  0x88   :  { %v173_v48 = vpop.permute.xlu1 %172 }
  0x8b   :  { %v178_v50 = vpop.permute.xlu0 %177 }
  0x8c   :  { %v183_v56 = vpop.permute.xlu1 %182 }
  0x8f   :  { %v287_v5 = vpop.permute.xlu0 %286 }
  0x90   :  { %v292_v7 = vpop.permute.xlu1 %291 }
  0x93   :  { %v297_v13 = vpop.permute.xlu0 %296 }
  0x94   :  { %v400_v23 = vpop.permute.xlu1 %399 }
  0x97   :  { %v405_v25 = vpop.permute.xlu0 %404 }
  0xda   :  { %v147_v28 = vpop.f32.mrb[0].mxu0 }
  0xdb   :  { %v796_v29 = vpop.f32.mrb[1].mxu0  ;;  %v148_v30 = vadd.f32 %v147_v28, %v55_v27 }
  0xdd   :  { %v161_v35 = vmax.f32 %v148_v30, 0.0 }
  0xde   :  { %v152_v32 = vpop.f32.mrb[2].mxu0 }
  0xdf   :  { %v153_v33 = vadd.f32 %v152_v32, %v60_v31  ;;  %v799_v34 = vpop.f32.mrb[3].mxu0  ;;  %v410_v31 = vpop.permute.xlu1 %409 }
  0xe1   :  { %v162_v36 = vmax.f32 %v153_v33, 0.0 }
  0xe2   :  { %v157_v38 = vpop.f32.mrb[4].mxu0 }
  0xe3   :  { %v158_v39 = vadd.f32 %v157_v38, %v65_v37  ;;  %v802_v40 = vpop.f32.mrb[5].mxu0  ;;  %v883_v41 = vpack.c.bf16 %v162_v36, %v161_v35  ;;  %v504_v37 = vld [vmem:[%s1178_s9] sm:$0xff]  ;;  %v505_v38 = vld [vmem:[%s1178_s9 + $0x8] sm:$0xff] }
  0xe5   :  { %v163_v42 = vmax.f32 %v158_v39, 0.0  ;;  %884 = vmatpush3.bf16.msra.mxu1 %v883_v41  ;;  %v506_v39 = vld [vmem:[%s1178_s9 + $0x10] sm:$0xff] }
  0xe6   :  { %807 = vmatprep.subr.mxu1 %v907_v4 }
  0xe9   :  { %808 = vmatpush3.msra.mxu1 %v163_v42  ;;  %v513_v42 = vpop.permute.xlu0 %512 }
  0xea   :  { %810 = vmatmul.mubr.msk.f32.vlgmr.msra.gmra.mrb[0].mxu1 %vm185_vm5, %v164_v43  ;;  %888 = vmatprep.subr.bf16.mxu1 %v904_v0 }
  0xeb   :  { %812 = vmatprep.mubr.msk.f32.mxu1 %vm906_vm3, %v907_v4 }
  0xee   :  { %813 = vmatmul.mubr.msk.f32.gmra.mrb[2].mxu1 %vm185_vm5, %v165_v44  ;;  %v518_v44 = vpop.permute.xlu1 %517 }
  0xef   :  { %815 = vmatprep.mubr.msk.f32.mxu1 %vm906_vm3, %v907_v4 }
  0xf2   :  { %816 = vmatmul.mubr.msk.f32.gmra.mrb[4].mxu1 %vm185_vm5, %v166_v45 }
  0xf3   :  { %839 = vmatprep.mubr.msk.f32.mxu1 %vm906_vm3, %v907_v4 }
 0x1bd   :  { %v261_v46 = vpop.f32.mrb[0].mxu1 }
 0x1be   :  { %v811_v47 = vpop.f32.mrb[1].mxu1  ;;  %v262_v49 = vadd.f32 %v261_v46, %v173_v48 }
 0x1c0   :  { %v275_v54 = vmax.f32 %v262_v49, 0.0 }
 0x1c1   :  { %v266_v51 = vpop.f32.mrb[2].mxu1 }
 0x1c2   :  { %v267_v52 = vadd.f32 %v266_v51, %v178_v50  ;;  %v814_v53 = vpop.f32.mrb[3].mxu1  ;;  %v523_v50 = vpop.permute.xlu0 %522 }
 0x1c4   :  { %v276_v55 = vmax.f32 %v267_v52, 0.0 }
 0x1c5   :  { %v271_v57 = vpop.f32.mrb[4].mxu1 }
 0x1c6   :  { %v886_v58 = vpack.c.bf16 %v276_v55, %v275_v54  ;;  %v272_v59 = vadd.f32 %v271_v57, %v183_v56  ;;  %v817_v60 = vpop.f32.mrb[5].mxu1  ;;  %v617_v56 = vld [vmem:[%s1179_s11] sm:$0xff]  ;;  %v618_v57 = vld [vmem:[%s1179_s11 + $0x8] sm:$0xff] }
 0x1c8   :  { %887 = vmatpush3.bf16.msra.mxu0 %v886_v58  ;;  %v277_v61 = vmax.f32 %v272_v59, 0.0  ;;  %v619_v58 = vld [vmem:[%s1179_s11 + $0x10] sm:$0x3]  ;;  %v626_v59 = vpop.permute.xlu1 %625 }
 0x1c9   :  { %822 = vmatprep.subr.mxu0 %v907_v4 }
 0x1cc   :  { %823 = vmatpush3.msra.mxu0 %v277_v61 }
 0x1cd   :  { %825 = vmatmul.mubr.msk.f32.vlgmr.msra.gmra.mrb[6].mxu0 %vm185_vm5, %v278_v62  ;;  %891 = vmatprep.subr.bf16.mxu0 %v904_v0 }
 0x1ce   :  { %827 = vmatprep.mubr.msk.f32.mxu0 %vm906_vm3, %v907_v4 }
 0x1d1   :  { %828 = vmatmul.mubr.msk.f32.gmra.mrb[8].mxu0 %vm185_vm5, %v279_v63  ;;  %v631_v63 = vpop.permute.xlu0 %630 }
 0x1d2   :  { %830 = vmatprep.mubr.msk.f32.mxu0 %vm906_vm3, %v907_v4 }
 0x1d5   :  { %831 = vmatmul.mubr.msk.f32.gmra.mrb[10].mxu0 %vm185_vm5, %v280_v1 }
 0x1d6   :  { %854 = vmatprep.mubr.msk.f32.mxu0 %vm906_vm3, %v907_v4 }
 0x2a0   :  { %v374_v2 = vpop.f32.mrb[6].mxu0 }
 0x2a1   :  { %v826_v3 = vpop.f32.mrb[7].mxu0  ;;  %v375_v6 = vadd.f32 %v374_v2, %v287_v5 }
 0x2a3   :  { %v388_v11 = vmax.f32 %v375_v6, 0.0 }
 0x2a4   :  { %v379_v8 = vpop.f32.mrb[8].mxu0 }
 0x2a5   :  { %v380_v9 = vadd.f32 %v379_v8, %v292_v7  ;;  %v829_v10 = vpop.f32.mrb[9].mxu0 }
 0x2a7   :  { %v389_v12 = vmax.f32 %v380_v9, 0.0 }
 0x2a8   :  { %v384_v14 = vpop.f32.mrb[10].mxu0 }
 0x2a9   :  { %v889_v15 = vpack.c.bf16 %v389_v12, %v388_v11  ;;  %v385_v16 = vadd.f32 %v384_v14, %v297_v13  ;;  %v832_v17 = vpop.f32.mrb[11].mxu0 }
 0x2ab   :  { %890 = vmatpush3.bf16.msra.mxu1 %v889_v15  ;;  %v390_v18 = vmax.f32 %v385_v16, 0.0 }
 0x2ac   :  { %837 = vmatprep.subr.mxu1 %v907_v4 }
 0x2af   :  { %838 = vmatpush3.msra.mxu1 %v390_v18 }
 0x2b0   :  { %840 = vmatmul.mubr.msk.f32.vlgmr.msra.gmra.mrb[6].mxu1 %vm185_vm5, %v391_v19  ;;  %894 = vmatprep.subr.bf16.mxu1 %v904_v0 }
 0x2b1   :  { %842 = vmatprep.mubr.msk.f32.mxu1 %vm906_vm3, %v907_v4 }
 0x2b4   :  { %843 = vmatmul.mubr.msk.f32.gmra.mrb[8].mxu1 %vm185_vm5, %v392_v20 }
 0x2b5   :  { %845 = vmatprep.mubr.msk.f32.mxu1 %vm906_vm3, %v907_v4 }
 0x2b8   :  { %846 = vmatmul.mubr.msk.f32.gmra.mrb[10].mxu1 %vm185_vm5, %v393_v21 }
 0x2b9   :  { %869 = vmatprep.mubr.msk.f32.mxu1 %vm906_vm3, %v907_v4 }
 0x383   :  { %v487_v0 = vpop.f32.mrb[6].mxu1 }
 0x384   :  { %v841_v22 = vpop.f32.mrb[7].mxu1  ;;  %v488_v24 = vadd.f32 %v487_v0, %v400_v23 }
 0x386   :  { %v501_v29 = vmax.f32 %v488_v24, 0.0 }
 0x387   :  { %v492_v26 = vpop.f32.mrb[8].mxu1 }
 0x388   :  { %v493_v27 = vadd.f32 %v492_v26, %v405_v25  ;;  %v844_v28 = vpop.f32.mrb[9].mxu1 }
 0x38a   :  { %v502_v30 = vmax.f32 %v493_v27, 0.0 }
 0x38b   :  { %v497_v32 = vpop.f32.mrb[10].mxu1 }
 0x38c   :  { %v892_v33 = vpack.c.bf16 %v502_v30, %v501_v29  ;;  %v498_v34 = vadd.f32 %v497_v32, %v410_v31  ;;  %v847_v35 = vpop.f32.mrb[11].mxu1 }
 0x38e   :  { %893 = vmatpush3.bf16.msra.mxu0 %v892_v33  ;;  %v503_v36 = vmax.f32 %v498_v34, 0.0 }
 0x38f   :  { %852 = vmatprep.subr.mxu0 %v907_v4 }
 0x392   :  { %853 = vmatpush3.msra.mxu0 %v503_v36 }
 0x393   :  { %855 = vmatmul.mubr.msk.f32.vlgmr.msra.gmra.mrb[12].mxu0 %vm185_vm5, %v504_v37 }
 0x394   :  { %857 = vmatprep.mubr.msk.f32.mxu0 %vm906_vm3, %v907_v4 }
 0x397   :  { %858 = vmatmul.mubr.msk.f32.gmra.mrb[14].mxu0 %vm185_vm5, %v505_v38 }
 0x398   :  { %860 = vmatprep.mubr.msk.f32.mxu0 %vm906_vm3, %v907_v4 }
 0x39b   :  { %861 = vmatmul.mubr.msk.f32.gmra.mrb[16].mxu0 %vm185_vm5, %v506_v39 }
 0x466   :  { %v600_v40 = vpop.f32.mrb[12].mxu0 }
 0x467   :  { %v856_v41 = vpop.f32.mrb[13].mxu0  ;;  %v601_v43 = vadd.f32 %v600_v40, %v513_v42 }
 0x469   :  { %v614_v48 = vmax.f32 %v601_v43, 0.0 }
 0x46a   :  { %v605_v45 = vpop.f32.mrb[14].mxu0 }
 0x46b   :  { %v606_v46 = vadd.f32 %v605_v45, %v518_v44  ;;  %v859_v47 = vpop.f32.mrb[15].mxu0 }
 0x46d   :  { %v615_v49 = vmax.f32 %v606_v46, 0.0 }
 0x46e   :  { %v610_v51 = vpop.f32.mrb[16].mxu0 }
 0x46f   :  { %v895_v52 = vpack.c.bf16 %v615_v49, %v614_v48  ;;  %v611_v53 = vadd.f32 %v610_v51, %v523_v50  ;;  %v862_v54 = vpop.f32.mrb[17].mxu0 }
 0x471   :  { %896 = vmatpush3.bf16.msra.mxu1 %v895_v52  ;;  %v616_v55 = vmax.f32 %v611_v53, 0.0 }
 0x472   :  { %867 = vmatprep.subr.mxu1 %v907_v4 }
 0x475   :  { %868 = vmatpush3.msra.mxu1 %v616_v55 }
 0x476   :  { %870 = vmatmul.mubr.msk.f32.vlgmr.msra.gmra.mrb[12].mxu1 %vm185_vm5, %v617_v56 }
 0x477   :  { %872 = vmatprep.mubr.msk.f32.mxu1 %vm906_vm3, %v907_v4 }
 0x47a   :  { %873 = vmatmul.mubr.msk.f32.gmra.mrb[14].mxu1 %vm185_vm5, %v618_v57 }
 0x47b   :  { %875 = vmatprep.mubr.msk.f32.mxu1 %vm906_vm3, %v907_v4  ;;  %v636_v4 = vpop.permute.xlu1 %635 }
 0x47e   :  { %876 = vmatmul.mubr.msk.f32.gmra.mrb[16].mxu1 %vm185_vm5, %v619_v58 }
 0x549   :  { %v713_v60 = vpop.f32.mrb[12].mxu1 }
 0x54a   :  { %v714_v61 = vadd.f32 %v713_v60, %v626_v59  ;;  %v871_v62 = vpop.f32.mrb[13].mxu1 }
 0x54c   :  { %728 = vst.msk [vmem:[%s1180_s13] sm:$0xff] %vm727_vm6, %v714_v61 }
 0x54d   :  { %v718_v1 = vpop.f32.mrb[14].mxu1 }
 0x54e   :  { %v719_v2 = vadd.f32 %v718_v1, %v631_v63  ;;  %v874_v3 = vpop.f32.mrb[15].mxu1 }
 0x550   :  { %729 = vst.msk [vmem:[%s1180_s13 + $0x8] sm:$0xff] %vm727_vm6, %v719_v2 }
 0x551   :  { %v723_v5 = vpop.f32.mrb[16].mxu1 }
 0x552   :  { %v724_v6 = vadd.f32 %v723_v5, %v636_v4  ;;  %v877_v7 = vpop.f32.mrb[17].mxu1 }
 0x554   :  { %731 = vst.msk [vmem:[%s1180_s13 + $0x10] sm:$0x3] %vm730_vm7, %v724_v6 }

</bundles_post_ra>
